<compile_context>
chip_gen: v7x
topology: tpu7x:2x2x1
jax: 0.10.0
libtpu: 0.0.40
codegen_flags: <defaults>
</compile_context>

<pallas_src>
import functools

import jax
import jax.numpy as jnp
from jax import lax
from jax.experimental import pallas as pl
from jax.experimental.pallas import tpu as pltpu

_LANES = 128


def _argmax_one_hot_kernel(x_ref, o_ref, m_ref, a_ref, *, n, tile_elems):
    """x_ref: (TILE_R, 128) input tile; o_ref: (1, padded_nc) i32 one-hot.

    m_ref: (1,1) f32 running max; a_ref: (1,1) i32 running argmax.
    `n` is the true (unpadded) flattened element count; `tile_elems` the
    number of elements covered by one tile (TILE_R * 128).
    """
    i = pl.program_id(0)
    x = x_ref[...].astype(jnp.float32)
    tr, tc = x.shape

    # Local (row-major) flat index within this tile.
    row_i = lax.broadcasted_iota(jnp.int32, (tr, tc), 0)
    lane_i = lax.broadcasted_iota(jnp.int32, (tr, tc), 1)
    local_idx = row_i * tc + lane_i

    # Tail / out-of-bounds mask: global index = tile_base + local_idx < n.
    # Only the scalar (n - tile_base) depends on the grid step.
    tile_base = i * tile_elems
    remaining = jnp.int32(n) - tile_base
    valid = local_idx < remaining

    xm = jnp.where(valid, x, jnp.float32(-jnp.inf))

    # Fused single pass over the tile: max and first index attaining it.
    tile_max = jnp.max(xm, keepdims=True)                      # (1,1) f32
    match = (xm == tile_max) & valid
    sentinel = jnp.int32(tile_elems)
    tile_arg = tile_base + jnp.min(
        jnp.where(match, local_idx, sentinel), keepdims=True)  # (1,1) i32

    @pl.when(i == 0)
    def _():
        m_ref[...] = tile_max
        a_ref[...] = tile_arg

    @pl.when(i > 0)
    def _():
        better = tile_max > m_ref[...]  # ties keep the earlier (lower) index
        m_ref[...] = jnp.where(better, tile_max, m_ref[...])
        a_ref[...] = jnp.where(better, tile_arg, a_ref[...])

    @pl.when(i == pl.num_programs(0) - 1)
    def _():
        cls = lax.broadcasted_iota(jnp.int32, o_ref.shape, 1)
        o_ref[...] = (cls == a_ref[...]).astype(jnp.int32)


def make_one_hot(x, num_classes, *, tile_rows=2048):
    """Equivalent of MakeOneHot(num_classes)(x). Returns int32[num_classes]."""
    # Keep native f32/bf16 through the BlockSpec; cast other dtypes once.
    if x.dtype not in (jnp.float32, jnp.bfloat16):
        x = x.astype(jnp.float32)
    flat = x.reshape(-1)
    n = flat.shape[0]
    rows = pl.cdiv(n, _LANES)
    # Pad only the ragged tail (values irrelevant: masked in-kernel).
    if rows * _LANES != n:
        flat = jnp.pad(flat, (0, rows * _LANES - n))
    x2d = flat.reshape(rows, _LANES)

    # Tile the row axis. Cap ~2048 rows (1 MiB f32 / 0.5 MiB bf16 per buffer):
    # double-buffered this stays far under the 32 MiB scoped-VMEM default on
    # v5e / v6e / v7x while still hitting the HBM roofline.
    cap = max(8, (int(tile_rows) // 8) * 8)          # keep (8,128) legality
    tile_r = rows if rows <= cap else cap
    grid = pl.cdiv(rows, tile_r)

    # Lane-dense output block (unmasked stores); slice back in the wrapper.
    padded_nc = _LANES * pl.cdiv(num_classes, _LANES)

    kernel = functools.partial(
        _argmax_one_hot_kernel, n=n, tile_elems=tile_r * _LANES)

    out = pl.pallas_call(
        kernel,
        out_shape=jax.ShapeDtypeStruct((1, padded_nc), jnp.int32),
        grid=(grid,),
        in_specs=[pl.BlockSpec((tile_r, _LANES), lambda i: (i, 0))],
        out_specs=pl.BlockSpec((1, padded_nc), lambda i: (0, 0)),
        scratch_shapes=[pltpu.VMEM((1, 1), jnp.float32),
                        pltpu.VMEM((1, 1), jnp.int32)],
        compiler_params=pltpu.CompilerParams(
            dimension_semantics=("arbitrary",)),
        cost_estimate=pl.CostEstimate(
            flops=2 * n,
            transcendentals=0,
            bytes_accessed=int(n) * flat.dtype.itemsize + int(padded_nc) * 4),
    )(x2d)
    return out[0, :num_classes]


if __name__ == "__main__":
    key = jax.random.PRNGKey(0)
    k1, k2, k3 = jax.random.split(key, 3)

    # Case 1: 4-D f32 input, numel divisible by 128 (zero-copy path, grid=1).
    x1 = jax.random.normal(k1, (2, 4, 16, 16), dtype=jnp.float32)  # n = 2048
    nc1 = 2048
    out1 = jax.block_until_ready(make_one_hot(x1, nc1))
    ref1 = jax.nn.one_hot(jnp.argmax(x1.reshape(-1)), nc1, dtype=jnp.int32)
    assert out1.shape == (nc1,) and out1.dtype == jnp.int32
    assert bool(jnp.all(out1 == ref1)) and int(jnp.sum(out1)) == 1

    # Case 2: ragged numel, bf16 input, num_classes not a multiple of 128.
    x2 = jax.random.normal(k2, (3, 50), dtype=jnp.bfloat16)        # n = 150
    nc2 = 150
    out2 = jax.block_until_ready(make_one_hot(x2, nc2))
    ref2 = jax.nn.one_hot(
        jnp.argmax(x2.astype(jnp.float32).reshape(-1)), nc2, dtype=jnp.int32)
    assert out2.shape == (nc2,) and out2.dtype == jnp.int32
    assert bool(jnp.all(out2 == ref2)) and int(jnp.sum(out2)) == 1

    # Case 3: force the multi-tile grid path (small tile cap) to exercise the
    # running-max merge and the out-of-bounds last-tile masking.
    x3 = jax.random.normal(k3, (2, 4, 16, 16), dtype=jnp.float32)  # 16 rows
    nc3 = 2048
    out3 = jax.block_until_ready(make_one_hot(x3, nc3, tile_rows=8))  # grid=2
    ref3 = jax.nn.one_hot(jnp.argmax(x3.reshape(-1)), nc3, dtype=jnp.int32)
    assert bool(jnp.all(out3 == ref3)) and int(jnp.sum(out3)) == 1

    print("KERNEL_OK")
</pallas_src>

<mosaic_0001>
module attributes {stable_mosaic.version = 11 : i64} {
  func.func @_argmax_one_hot_kernel(%arg0: i32, %arg1: memref<16x128xf32, #tpu.memory_space<vmem>>, %arg2: memref<1x2048xi32, #tpu.memory_space<vmem>>, %arg3: memref<1x1xf32, #tpu.memory_space<vmem>>, %arg4: memref<1x1xi32, #tpu.memory_space<vmem>>) attributes {dimension_semantics = [#tpu.dimension_semantics<arbitrary>], iteration_bounds = array<i64: 1>, scalar_prefetch = 0 : i64, scratch_operands = 2 : i64, tpu.core_type = #tpu.core_type<tc>, window_params = [{transform_indices = @transform_0, window_bounds = array<i64: 16, 128>}, {pipeline_mode = #tpu.pipeline_mode<synchronous>, transform_indices = @transform_1, window_bounds = array<i64: 1, 2048>}]} {
    %c0 = arith.constant 0 : index
    %c0_0 = arith.constant 0 : index
    %0 = vector.load %arg1[%c0, %c0_0] : memref<16x128xf32, #tpu.memory_space<vmem>>, vector<16x128xf32>
    %1 = tpu.iota {dimensions = array<i32: 0>} : vector<16x128xi32>
    %2 = tpu.iota {dimensions = array<i32: 1>} : vector<16x128xi32>
    %c128_i32 = arith.constant 128 : i32
    %3 = vector.broadcast %c128_i32 : i32 to vector<16x128xi32>
    %4 = arith.muli %1, %3 : vector<16x128xi32>
    %5 = arith.addi %4, %2 : vector<16x128xi32>
    %c2048_i32 = arith.constant 2048 : i32
    %6 = arith.muli %arg0, %c2048_i32 : i32
    %c2048_i32_1 = arith.constant 2048 : i32
    %7 = arith.subi %c2048_i32_1, %6 : i32
    %8 = vector.broadcast %7 : i32 to vector<16x128xi32>
    %9 = arith.cmpi slt, %5, %8 : vector<16x128xi32>
    %cst = arith.constant 0xFF800000 : f32
    %10 = vector.broadcast %cst : f32 to vector<16x128xf32>
    %11 = arith.select %9, %0, %10 : vector<16x128xi1>, vector<16x128xf32>
    %12 = vector.shape_cast %11 : vector<16x128xf32> to vector<1x16x128xf32>
    %cst_2 = arith.constant dense<0xFF800000> : vector<1xf32>
    %13 = vector.multi_reduction <maximumf>, %12, %cst_2 [1, 2] : vector<1x16x128xf32> to vector<1xf32>
    %14 = vector.shape_cast %13 : vector<1xf32> to vector<1x1x1xf32>
    %15 = vector.extract %14[0, 0, 0] : f32 from vector<1x1x1xf32>
    %16 = vector.broadcast %15 : f32 to vector<1x1xf32>
    %17 = vector.broadcast %16 : vector<1x1xf32> to vector<16x128xf32>
    %18 = arith.cmpf oeq, %11, %17 : vector<16x128xf32>
    %19 = arith.andi %18, %9 : vector<16x128xi1>
    %c2048_i32_3 = arith.constant 2048 : i32
    %20 = vector.broadcast %c2048_i32_3 : i32 to vector<16x128xi32>
    %21 = arith.select %19, %5, %20 : vector<16x128xi1>, vector<16x128xi32>
    %22 = vector.shape_cast %21 : vector<16x128xi32> to vector<1x16x128xi32>
    %cst_4 = arith.constant dense<2147483647> : vector<1xi32>
    %23 = vector.multi_reduction <minsi>, %22, %cst_4 [1, 2] : vector<1x16x128xi32> to vector<1xi32>
    %24 = vector.shape_cast %23 : vector<1xi32> to vector<1x1x1xi32>
    %25 = vector.extract %24[0, 0, 0] : i32 from vector<1x1x1xi32>
    %26 = vector.broadcast %25 : i32 to vector<1x1xi32>
    %27 = vector.broadcast %6 : i32 to vector<1x1xi32>
    %28 = arith.addi %27, %26 : vector<1x1xi32>
    %c0_i32 = arith.constant 0 : i32
    %29 = arith.cmpi eq, %arg0, %c0_i32 : i32
    %30 = arith.extui %29 : i1 to i32
    %c0_i32_5 = arith.constant 0 : i32
    %31 = arith.cmpi ne, %30, %c0_i32_5 : i32
    scf.if %31 {
      %c0_10 = arith.constant 0 : index
      %c0_11 = arith.constant 0 : index
      %38 = vector.load %arg3[%c0_10, %c0_11] : memref<1x1xf32, #tpu.memory_space<vmem>>, vector<1x1xf32>
      tpu.vector_store %arg3[%c0_10, %c0_11], %16 {strides = array<i32>} : memref<1x1xf32, #tpu.memory_space<vmem>>, vector<1x1xf32>,
      %c0_12 = arith.constant 0 : index
      %c0_13 = arith.constant 0 : index
      %39 = vector.load %arg4[%c0_12, %c0_13] : memref<1x1xi32, #tpu.memory_space<vmem>>, vector<1x1xi32>
      tpu.vector_store %arg4[%c0_12, %c0_13], %28 {strides = array<i32>} : memref<1x1xi32, #tpu.memory_space<vmem>>, vector<1x1xi32>,
    } else {
    }
    %c0_i32_6 = arith.constant 0 : i32
    %32 = arith.cmpi sgt, %arg0, %c0_i32_6 : i32
    %33 = arith.extui %32 : i1 to i32
    %c0_i32_7 = arith.constant 0 : i32
    %34 = arith.cmpi ne, %33, %c0_i32_7 : i32
    scf.if %34 {
      %c0_10 = arith.constant 0 : index
      %c0_11 = arith.constant 0 : index
      %38 = vector.load %arg3[%c0_10, %c0_11] : memref<1x1xf32, #tpu.memory_space<vmem>>, vector<1x1xf32>
      %39 = arith.cmpf ogt, %16, %38 : vector<1x1xf32>
      %c0_12 = arith.constant 0 : index
      %c0_13 = arith.constant 0 : index
      %40 = vector.load %arg3[%c0_12, %c0_13] : memref<1x1xf32, #tpu.memory_space<vmem>>, vector<1x1xf32>
      %41 = arith.select %39, %16, %40 : vector<1x1xi1>, vector<1x1xf32>
      %c0_14 = arith.constant 0 : index
      %c0_15 = arith.constant 0 : index
      %42 = vector.load %arg3[%c0_14, %c0_15] : memref<1x1xf32, #tpu.memory_space<vmem>>, vector<1x1xf32>
      tpu.vector_store %arg3[%c0_14, %c0_15], %41 {strides = array<i32>} : memref<1x1xf32, #tpu.memory_space<vmem>>, vector<1x1xf32>,
      %c0_16 = arith.constant 0 : index
      %c0_17 = arith.constant 0 : index
      %43 = vector.load %arg4[%c0_16, %c0_17] : memref<1x1xi32, #tpu.memory_space<vmem>>, vector<1x1xi32>
      %44 = arith.select %39, %28, %43 : vector<1x1xi1>, vector<1x1xi32>
      %c0_18 = arith.constant 0 : index
      %c0_19 = arith.constant 0 : index
      %45 = vector.load %arg4[%c0_18, %c0_19] : memref<1x1xi32, #tpu.memory_space<vmem>>, vector<1x1xi32>
      tpu.vector_store %arg4[%c0_18, %c0_19], %44 {strides = array<i32>} : memref<1x1xi32, #tpu.memory_space<vmem>>, vector<1x1xi32>,
    } else {
    }
    %c0_i32_8 = arith.constant 0 : i32
    %35 = arith.cmpi eq, %arg0, %c0_i32_8 : i32
    %36 = arith.extui %35 : i1 to i32
    %c0_i32_9 = arith.constant 0 : i32
    %37 = arith.cmpi ne, %36, %c0_i32_9 : i32
    scf.if %37 {
      %38 = tpu.iota {dimensions = array<i32: 1>} : vector<1x2048xi32>
      %c0_10 = arith.constant 0 : index
      %c0_11 = arith.constant 0 : index
      %39 = vector.load %arg4[%c0_10, %c0_11] : memref<1x1xi32, #tpu.memory_space<vmem>>, vector<1x1xi32>
      %40 = vector.broadcast %39 : vector<1x1xi32> to vector<1x2048xi32>
      %41 = arith.cmpi eq, %38, %40 : vector<1x2048xi32>
      %42 = arith.extui %41 : vector<1x2048xi1> to vector<1x2048xi32>
      %c0_12 = arith.constant 0 : index
      %c0_13 = arith.constant 0 : index
      %43 = vector.load %arg2[%c0_12, %c0_13] : memref<1x2048xi32, #tpu.memory_space<vmem>>, vector<1x2048xi32>
      tpu.vector_store %arg2[%c0_12, %c0_13], %42 {strides = array<i32>} : memref<1x2048xi32, #tpu.memory_space<vmem>>, vector<1x2048xi32>,
    } else {
    }
    return
  }
  func.func @transform_0(%arg0: i32) -> (i32, i32) {
    %c0_i32 = arith.constant 0 : i32
    %c0_i32_0 = arith.constant 0 : i32
    return %arg0, %c0_i32 : i32, i32
  }
  func.func @transform_1(%arg0: i32) -> (i32, i32) {
    %c0_i32 = arith.constant 0 : i32
    %c0_i32_0 = arith.constant 0 : i32
    %c0_i32_1 = arith.constant 0 : i32
    return %c0_i32, %c0_i32_0 : i32, i32
  }
}

</mosaic_0001>

<bundles_post_ra>
// kernel: tpu_custom_call.1
= control target key start
LH: loop header
LB: loop body
LE: loop exit
PB: predicated region body
PF: predicated region fallthrough
CT: control target
= control target key end

     0   :  { %6 = vsyncpa [#allocation5], 0  ;;  %s459_s0 = inlined_call_operand.hbm [shape: f32[16,128], index: 0, kind: input, shape index: {}]   ;;  %s460_s1 = inlined_call_operand.hbm [shape: s32[1,2048], index: 1, kind: output, shape index: {}]  }
   0x1   :  { %7 = vsyncpa [#allocation6], 0  ;;  %s339_s6 = smov [#allocation4]   ;;  %s291_s10 = scalar_lea.hbm %s459_s0, 256 }
   0x2   :  { %s13_s7 = sshll.u32 %s339_s6, 4  ;;  %p292_p0 = scmp.ne.s32.totalorder %s459_s0, %s291_s10  ;;  %s14_s7 = int_to_ptr.vmem [resolvable:$true] %s13_s7 }
   0x3   :  { %p295_p1 = scmp.lt.u32.totalorder %s291_s10, %s459_s0 }
   0x5   :  { %p297_p2 = pnand %p295_p1, %p292_p0 }
   0x7   :  { %300 = shalt.err (!%p297_p2)
}
   0x8   :  { %s301_s15 = scalar_lea.vmem %s14_s7, 256  ;;  %p306_p4 = scmp.lt.s32.totalorder %s14_s7, %s14_s7 }
   0x9   :  { %p302_p3 = scmp.ne.s32.totalorder %s14_s7, %s301_s15  ;;  %p307_p5 = scmp.lt.s32.totalorder %s301_s15, %s301_s15 }
   0xb   :  { %p308_p6 = por %p307_p5, %p306_p4 }
   0xd   :  { %p309_p7 = pnand %p308_p6, %p302_p3 }
   0xf   :  { %312 = shalt.err (!%p309_p7)
}
  0x10   :  { %s340_s16 = smov 128   ;;  %s341_s17 = smov 8  }
  0x11   :  { %19 = dma.hbm_to_vmem [thread:$0]  %s459_s0, 256, %s14_s7, [#allocation5], %s340_s16, %s340_s16, %s341_s17  }
  0x12   :  { %335 = dma.done.wait [#allocation5], 256  }
  0x13   :  { %336 = vsyncadd [#allocation5], 4294967040  ;;  %v25_v0 = vlaneseq  ;;  %v23_v7 = vld [vmem:[#allocation4] sm:$0xff]  ;;  %v24_v8 = vld [vmem:[#allocation4 + $0x8] sm:$0xff]  ;;  %vm91_vm2 = vcmask 0   ;;  %v342_v30 = vmov 0  }
  0x14   :  { %289 = vset.pattern.permute.xlu1 %v342_v30  ;;  %290 = vset.pattern.permute.xlu0 %v342_v30  ;;  %v343_v44 = vmov 1966171168   ;;  %s344_s21 = smov [#allocation7]  }
  0x15   :  { %v367_v1 = vshrl.u32 %v25_v0, 7  ;;  %v369_v2 = vand.u32 127, %v25_v0  ;;  %v169_v45 = vunpack.c.l.s4 %v343_v44  ;;  %s270_s22 = sshll.u32 %s344_s21, 4  ;;  %s271_s22 = int_to_ptr.vmem [resolvable:$true] %s270_s22 }
  0x16   :  { %s313_s23 = scalar_lea.vmem %s271_s22, 256  ;;  %p318_p9 = scmp.lt.s32.totalorder %s271_s22, %s271_s22 }
  0x17   :  { %v27_v3 = vadd.s32 8, %v367_v1  ;;  %v30_v4 = vmul.u32 128, %v367_v1  ;;  %v170_v46 = vunpack.c.0.s8 %v169_v45  ;;  %v130_v47 = vsub.s32 0, %v367_v1  ;;  %p314_p8 = scmp.ne.s32.totalorder %s271_s22, %s313_s23  ;;  %p319_p10 = scmp.lt.s32.totalorder %s313_s23, %s313_s23 }
  0x18   :  { %v109_v49 = vadd.s32 128, %v369_v2  ;;  %v110_v50 = vadd.s32 256, %v369_v2  ;;  %v111_v51 = vadd.s32 384, %v369_v2  ;;  %v112_v52 = vadd.s32 512, %v369_v2 }
  0x19   :  { %v31_v5 = vmul.u32 128, %v27_v3  ;;  %v32_v6 = vadd.s32 %v30_v4, %v369_v2  ;;  %v384_v48 = vsub.s32 %v170_v46, %v367_v1  ;;  %v113_v54 = vadd.s32 640, %v369_v2  ;;  %p320_p11 = por %p319_p10, %p318_p9 }
  0x1a   :  { %v114_v55 = vadd.s32 768, %v369_v2  ;;  %v115_v56 = vadd.s32 896, %v369_v2  ;;  %v116_v57 = vadd.s32 1024, %v369_v2  ;;  %v117_v59 = vadd.s32 1152, %v369_v2 }
  0x1b   :  { %v33_v9 = vadd.s32 %v31_v5, %v369_v2  ;;  %vm37_vm0 = vcmp.lt.s32.totalorder %v32_v6, 2048  ;;  %v118_v60 = vadd.s32 1280, %v369_v2  ;;  %v119_v61 = vadd.s32 1408, %v369_v2  ;;  %p321_p12 = pnand %p320_p11, %p314_p8 }
  0x1c   :  { %v39_v10 = vsel %vm37_vm0, %v23_v7, -inf  ;;  %v120_v62 = vadd.s32 1536, %v369_v2  ;;  %v121_v63 = vadd.s32 1664, %v369_v2  ;;  %v122_v0 = vadd.s32 1792, %v369_v2 }
  0x1d   :  { %vm38_vm1 = vcmp.lt.s32.totalorder %v33_v9, 2048  ;;  %v123_v1 = vadd.s32 1920, %v369_v2 }
  0x1e   :  { %v40_v11 = vsel %vm38_vm1, %v24_v8, -inf }
  0x1f   :  { %v41_v12 = vmax.f32 %v39_v10, %v40_v11 }
  0x21   :  { %42 = vmax.xlane.f32.xlu0 %v41_v12 }
  0xae   :  { %v43_v13 = vpop.xlane.xlu0 %42 }
  0xaf   :  { %v44_v14 = vrot.slane %v43_v13, 4 }
  0xb1   :  { %v45_v15 = vmax.f32 %v43_v13, %v44_v14 }
  0xb3   :  { %v46_v16 = vrot.slane %v45_v15, 2 }
  0xb5   :  { %v47_v17 = vmax.f32 %v45_v15, %v46_v16 }
  0xb7   :  { %v48_v18 = vrot.slane %v47_v17, 1 }
  0xb9   :  { %v49_v19 = vmax.f32 %v47_v17, %v48_v18 }
  0xbb   :  { %279 = vpush %v49_v19 }
  0xec   :  { %s280_s0 = spop %279 }
  0xed   :  { %v51_v20 = vstv %s280_s0 }
  0xee   :  { %vm52_vm3 = vcmp.eq.f32.partialorder %v39_v10, %v51_v20  ;;  %vm53_vm4 = vcmp.eq.f32.partialorder %v40_v11, %v51_v20 }
  0xef   :  { %vm54_vm5 = vmand %vm52_vm3, %vm37_vm0 }
  0xf0   :  { %vm55_vm6 = vmand %vm53_vm4, %vm38_vm1  ;;  %v56_v21 = vsel %vm54_vm5, %v32_v6, 2048 }
  0xf1   :  { %v57_v22 = vsel %vm55_vm6, %v33_v9, 2048 }
  0xf2   :  { %vm58_vm7 = vcmp.lt.s32.totalorder %v56_v21, %v57_v22 }
  0xf3   :  { %v59_v23 = vsel %vm58_vm7, %v56_v21, %v57_v22 }
  0xf4   :  { %v61_v24 = vshra.s32 %v59_v23, 16  ;;  %v60_v26 = vand.u32 65535, %v59_v23 }
  0xf6   :  { %v63_v25 = vcvt.s32.f32 %v61_v24  ;;  %v62_v28 = vcvt.s32.f32 %v60_v26 }
  0xf8   :  { %64 = vmin.xlane.f32.xlu0 %v63_v25 }
 0x185   :  { %v65_v27 = vpop.xlane.xlu0 %64 }
 0x186   :  { %vm66_vm8 = vcmp.eq.f32.partialorder %v63_v25, %v65_v27  ;;  %v71_v31 = vcvt.f32.s32 %v65_v27 }
 0x187   :  { %v67_v29 = vsel %vm66_vm8, %v62_v28, inf }
 0x188   :  { %68 = vmin.xlane.f32.xlu1 %v67_v29  ;;  %v72_v33 = vshll.u32 %v71_v31, 16 }
 0x215   :  { %v69_v32 = vpop.xlane.xlu1 %68 }
 0x216   :  { %v70_v34 = vcvt.f32.s32 %v69_v32 }
 0x218   :  { %v73_v35 = vadd.s32 %v72_v33, %v70_v34 }
 0x21a   :  { %v74_v36 = vrot.slane %v73_v35, 4 }
 0x21c   :  { %vm75_vm9 = vcmp.lt.s32.totalorder %v73_v35, %v74_v36 }
 0x21d   :  { %v76_v37 = vsel %vm75_vm9, %v73_v35, %v74_v36 }
 0x21e   :  { %v77_v38 = vrot.slane %v76_v37, 2 }
 0x220   :  { %vm78_vm10 = vcmp.lt.s32.totalorder %v76_v37, %v77_v38 }
 0x221   :  { %v79_v39 = vsel %vm78_vm10, %v76_v37, %v77_v38 }
 0x222   :  { %v80_v40 = vrot.slane %v79_v39, 1 }
 0x224   :  { %vm81_vm11 = vcmp.lt.s32.totalorder %v79_v39, %v80_v40 }
 0x225   :  { %v82_v41 = vsel %vm81_vm11, %v79_v39, %v80_v40 }
 0x226   :  { %281 = vpush %v82_v41 }
 0x257   :  { %s282_s20 = spop %281 }
 0x258   :  { %v84_v42 = vstv %s282_s20 }
 0x259   :  { %93 = vst.msk [vmem:[#allocation3] sm:$0x1] %vm91_vm2, %v84_v42 }
 0x260   :  { %v124_v43 = vld [vmem:[#allocation3] sm:$0x1] }
 0x261   :  { %126 = vperm.xlu1 %289, %v124_v43  }
 0x2e0   :  { %v127_v53 = vpop.permute.xlu1 %126 }
 0x2e1   :  { %v131_v58 = vrot.slane %v127_v53, %v130_v47 }
 0x2e3   :  { %vm132_vm12 = vcmp.eq.s32.totalorder %v369_v2, %v131_v58  ;;  %vm133_vm13 = vcmp.eq.s32.totalorder %v109_v49, %v131_v58  ;;  %vm134_vm14 = vcmp.eq.s32.totalorder %v110_v50, %v131_v58  ;;  %vm135_vm15 = vcmp.eq.s32.totalorder %v111_v51, %v131_v58 }
 0x2e4   :  { %vm136_vm0 = vcmp.eq.s32.totalorder %v112_v52, %v131_v58  ;;  %vm137_vm1 = vcmp.eq.s32.totalorder %v113_v54, %v131_v58  ;;  %vm138_vm2 = vcmp.eq.s32.totalorder %v114_v55, %v131_v58  ;;  %vm139_vm3 = vcmp.eq.s32.totalorder %v115_v56, %v131_v58 }
 0x2e5   :  { %vm140_vm4 = vcmp.eq.s32.totalorder %v116_v57, %v131_v58  ;;  %vm141_vm5 = vcmp.eq.s32.totalorder %v117_v59, %v131_v58  ;;  %vm142_vm6 = vcmp.eq.s32.totalorder %v118_v60, %v131_v58  ;;  %vm143_vm7 = vcmp.eq.s32.totalorder %v119_v61, %v131_v58 }
 0x2e6   :  { %vm144_vm8 = vcmp.eq.s32.totalorder %v120_v62, %v131_v58  ;;  %vm145_vm9 = vcmp.eq.s32.totalorder %v121_v63, %v131_v58  ;;  %vm146_vm10 = vcmp.eq.s32.totalorder %v122_v0, %v131_v58  ;;  %vm147_vm11 = vcmp.eq.s32.totalorder %v123_v1, %v131_v58 }
 0x2e7   :  { %v148_v3 = vsel %vm132_vm12, 1, %v342_v30  ;;  %v149_v4 = vsel %vm133_vm13, 1, %v342_v30  ;;  %v150_v5 = vsel %vm134_vm14, 1, %v342_v30  ;;  %v151_v6 = vsel %vm135_vm15, 1, %v342_v30 }
 0x2e8   :  { %v152_v7 = vsel %vm136_vm0, 1, %v342_v30  ;;  %v153_v8 = vsel %vm137_vm1, 1, %v342_v30  ;;  %v154_v9 = vsel %vm138_vm2, 1, %v342_v30  ;;  %v155_v2 = vsel %vm139_vm3, 1, %v342_v30 }
 0x2e9   :  { %v156_v10 = vsel %vm140_vm4, 1, %v342_v30  ;;  %v157_v11 = vsel %vm141_vm5, 1, %v342_v30  ;;  %v158_v12 = vsel %vm142_vm6, 1, %v342_v30  ;;  %v159_v13 = vsel %vm143_vm7, 1, %v342_v30 }
 0x2ea   :  { %v160_v14 = vsel %vm144_vm8, 1, %v342_v30  ;;  %v161_v15 = vsel %vm145_vm9, 1, %v342_v30  ;;  %v162_v16 = vsel %vm146_vm10, 1, %v342_v30  ;;  %v163_v17 = vsel %vm147_vm11, 1, %v342_v30 }
 0x2eb   :  { %v164_v18 = vcombine.low %v148_v3, %v149_v4  ;;  %v165_v19 = vcombine.low %v150_v5, %v151_v6  ;;  %v166_v20 = vcombine.low %v152_v7, %v153_v8  ;;  %v167_v21 = vcombine.low %v154_v9, %v155_v2 }
 0x2ec   :  { %v213_v22 = vcombine.low %v156_v10, %v157_v11  ;;  %v214_v23 = vcombine.low %v158_v12, %v159_v13  ;;  %v215_v24 = vcombine.low %v160_v14, %v161_v15  ;;  %v216_v25 = vcombine.low %v162_v16, %v163_v17 }
 0x2ed   :  { %v174_v26 = vrot.slane %v164_v18, %v384_v48  ;;  %v181_v27 = vrot.slane %v165_v19, %v384_v48  ;;  %v188_v28 = vrot.slane %v166_v20, %v384_v48  ;;  %v195_v29 = vrot.slane %v167_v21, %v384_v48 }
 0x2ee   :  { %v223_v31 = vrot.slane %v213_v22, %v384_v48  ;;  %v230_v30 = vrot.slane %v214_v23, %v384_v48  ;;  %v237_v32 = vrot.slane %v215_v24, %v384_v48  ;;  %v244_v33 = vrot.slane %v216_v25, %v384_v48 }
 0x2ef   :  { %v196_v34 = vcombine.low %v174_v26, %v181_v27  ;;  %v197_v35 = vcombine.low %v188_v28, %v195_v29 }
 0x2f0   :  { %v245_v36 = vcombine.low %v223_v31, %v230_v30  ;;  %v246_v37 = vcombine.low %v237_v32, %v244_v33 }
 0x2f1   :  { %v204_v38 = vrot.slane %v196_v34, %v384_v48  ;;  %v211_v39 = vrot.slane %v197_v35, %v384_v48 }
 0x2f2   :  { %v253_v40 = vrot.slane %v245_v36, %v384_v48  ;;  %v260_v41 = vrot.slane %v246_v37, %v384_v48 }
 0x2f3   :  { %v212_v42 = vcombine.low %v204_v38, %v211_v39 }
 0x2f4   :  { %v261_v43 = vcombine.low %v253_v40, %v260_v41 }
 0x2f5   :  { %262 = vst [vmem:[#allocation7] sm:$0xff] %v212_v42 }
 0x2f6   :  { %263 = vst [vmem:[#allocation7 + $0x8] sm:$0xff] %v261_v43 }
 0x2f7   :  { %324 = shalt.err (!%p321_p12)
}
 0x2f8   :  { %s325_s26 = scalar_lea.hbm %s460_s1, 256 }
 0x2f9   :  { %p326_p13 = scmp.ne.s32.totalorder %s460_s1, %s325_s26  ;;  %p329_p0 = scmp.lt.u32.totalorder %s325_s26, %s460_s1 }
 0x2fb   :  { %p331_p1 = pnand %p329_p0, %p326_p13 }
 0x2fd   :  { %334 = shalt.err (!%p331_p1)
}
 0x2fe   :  { %273 = dma.vmem_to_hbm [thread:$0]  %s271_s22, 256, %s460_s1, [#allocation6]  }
 0x2ff   :  { %337 = dma.done.wait [#allocation6], 256  }
 0x300   :  { %338 = vsyncadd [#allocation6], 4294967040 }
 0x301   :  { %277 = vsyncpa [#allocation5], 1 }
 0x302   :  { %278 = vsyncpa [#allocation6], 1 }

</bundles_post_ra>
